<compile_context>
chip_gen: v5e
topology: v5e:2x2
jax: 0.10.0
libtpu: 0.0.40
codegen_flags: <defaults>
</compile_context>

<pallas_src>
import jax
import jax.numpy as jnp
from jax.experimental import pallas as pl
from jax.experimental.pallas import tpu as pltpu


def mlp_kernel(x_ref, w1_ref, b1_ref, w2_ref, b2_ref, w3_ref, b3_ref, o_ref):
    x = x_ref[...].astype(jnp.float32)                               # (TILE_B, 30)

    # fc1 + ReLU
    h1 = jnp.dot(x, w1_ref[...], preferred_element_type=jnp.float32) + b1_ref[...]
    h1 = jnp.maximum(h1, 0.0)                                        # (TILE_B, 20)

    # fc2 + ReLU
    h2 = jnp.dot(h1, w2_ref[...], preferred_element_type=jnp.float32) + b2_ref[...]
    h2 = jnp.maximum(h2, 0.0)                                        # (TILE_B, 10)

    # fc3
    logits = jnp.dot(h2, w3_ref[...], preferred_element_type=jnp.float32) + b3_ref[...]  # (TILE_B, 2)

    # log_softmax over dim=1 (numerically stable)
    m = jnp.max(logits, axis=1, keepdims=True)
    z = logits - m
    lse = jnp.log(jnp.sum(jnp.exp(z), axis=1, keepdims=True))
    o_ref[...] = (z - lse).astype(o_ref.dtype)


def net_forward(x, params, tile_b=1024):
    """Forward pass of Net. x: (B, 30) float32. Returns (B, 2) log-probs."""
    w1, b1, w2, b2, w3, b3 = params
    B, F_in = x.shape

    # Tile the batch: multiple of 8, capped at tile_b, shrunk for tiny batches.
    tb = min(tile_b, max(8, ((B + 7) // 8) * 8))
    n_tiles = pl.cdiv(B, tb)
    B_pad = n_tiles * tb
    if B_pad != B:
        # Zero-pad the tail tile; padded rows produce finite log-probs and are sliced off.
        x = jnp.pad(x, ((0, B_pad - B), (0, 0)))

    # x / out block only on batch; feature dims are full-width.
    x_spec = pl.BlockSpec((tb, F_in), lambda i: (i, 0))
    out_spec = pl.BlockSpec((tb, 2), lambda i: (i, 0))
    # Weights/biases: constant index_map -> resident in VMEM across all grid steps.
    resident = lambda shape: pl.BlockSpec(shape, lambda i: tuple(0 for _ in shape))

    out = pl.pallas_call(
        mlp_kernel,
        out_shape=jax.ShapeDtypeStruct((B_pad, 2), jnp.float32),
        grid=(n_tiles,),
        in_specs=[
            x_spec,
            resident(w1.shape), resident(b1.shape),
            resident(w2.shape), resident(b2.shape),
            resident(w3.shape), resident(b3.shape),
        ],
        out_specs=out_spec,
        compiler_params=pltpu.CompilerParams(
            # Batch tiles are independent -> let both v7x TensorCores work on them.
            dimension_semantics=("parallel",),
            # Explicit VMEM budget sized for v7x (64 MiB physical / 32 MiB scoped default);
            # double-buffered (tb,30) f32 tiles + resident weights fit with huge headroom.
            vmem_limit_bytes=32 * 1024 * 1024,
        ),
    )(x, w1, b1, w2, b2, w3, b3)

    return out[:B]


def init_params(key):
    """Deterministic init mimicking PyTorch nn.Linear default: U(-1/sqrt(fan_in), 1/sqrt(fan_in)).
    Weights are returned already transposed to (in, out)."""
    def linear(key, fan_in, fan_out):
        kw, kb = jax.random.split(key)
        bound = 1.0 / jnp.sqrt(fan_in)
        w = jax.random.uniform(kw, (fan_in, fan_out), jnp.float32, -bound, bound)
        b = jax.random.uniform(kb, (1, fan_out), jnp.float32, -bound, bound)
        return w, b

    k1, k2, k3 = jax.random.split(key, 3)
    w1, b1 = linear(k1, 30, 20)
    w2, b2 = linear(k2, 20, 10)
    w3, b3 = linear(k3, 10, 2)
    return (w1, b1, w2, b2, w3, b3)


def reference_forward(x, params):
    """Pure-JAX reference for sanity checking."""
    w1, b1, w2, b2, w3, b3 = params
    h1 = jnp.maximum(x @ w1 + b1, 0.0)
    h2 = jnp.maximum(h1 @ w2 + b2, 0.0)
    logits = h2 @ w3 + b3
    return jax.nn.log_softmax(logits, axis=1)


if __name__ == "__main__":
    key = jax.random.PRNGKey(0)
    kx, kp = jax.random.split(key)

    batch = 8
    x = jax.random.normal(kx, (batch, 30), jnp.float32)
    params = init_params(kp)

    out = net_forward(x, params)
    out = jax.block_until_ready(out)

    ref = reference_forward(x, params)
    assert out.shape == (batch, 2)
    assert jnp.allclose(out, ref, atol=1e-5, rtol=1e-5), "mismatch vs reference"

    # Also exercise the multi-tile / padded-tail path (B not a multiple of the tile).
    batch2 = 2048 + 37
    x2 = jax.random.normal(kx, (batch2, 30), jnp.float32)
    out2 = jax.block_until_ready(net_forward(x2, params, tile_b=1024))
    ref2 = reference_forward(x2, params)
    assert out2.shape == (batch2, 2)
    assert jnp.allclose(out2, ref2, atol=1e-5, rtol=1e-5), "mismatch vs reference (tiled path)"

    print("KERNEL_OK")
</pallas_src>

<mosaic_0001>
module attributes {stable_mosaic.version = 11 : i64} {
  func.func @mlp_kernel(%arg0: i32, %arg1: memref<8x30xf32, #tpu.memory_space<vmem>>, %arg2: memref<30x20xf32, #tpu.memory_space<vmem>>, %arg3: memref<1x20xf32, #tpu.memory_space<vmem>>, %arg4: memref<20x10xf32, #tpu.memory_space<vmem>>, %arg5: memref<1x10xf32, #tpu.memory_space<vmem>>, %arg6: memref<10x2xf32, #tpu.memory_space<vmem>>, %arg7: memref<1x2xf32, #tpu.memory_space<vmem>>, %arg8: memref<8x2xf32, #tpu.memory_space<vmem>>) attributes {dimension_semantics = [#tpu.dimension_semantics<parallel>], iteration_bounds = array<i64: 1>, scalar_prefetch = 0 : i64, scratch_operands = 0 : i64, tpu.core_type = #tpu.core_type<tc>, window_params = [{transform_indices = @transform_0, window_bounds = array<i64: 8, 30>}, {pipeline_mode = #tpu.pipeline_mode<synchronous>, transform_indices = @transform_1, window_bounds = array<i64: 30, 20>}, {pipeline_mode = #tpu.pipeline_mode<synchronous>, transform_indices = @transform_2, window_bounds = array<i64: 1, 20>}, {pipeline_mode = #tpu.pipeline_mode<synchronous>, transform_indices = @transform_3, window_bounds = array<i64: 20, 10>}, {pipeline_mode = #tpu.pipeline_mode<synchronous>, transform_indices = @transform_4, window_bounds = array<i64: 1, 10>}, {pipeline_mode = #tpu.pipeline_mode<synchronous>, transform_indices = @transform_5, window_bounds = array<i64: 10, 2>}, {pipeline_mode = #tpu.pipeline_mode<synchronous>, transform_indices = @transform_6, window_bounds = array<i64: 1, 2>}, {transform_indices = @transform_7, window_bounds = array<i64: 8, 2>}]} {
    %c0 = arith.constant 0 : index
    %c0_0 = arith.constant 0 : index
    %0 = vector.load %arg1[%c0, %c0_0] : memref<8x30xf32, #tpu.memory_space<vmem>>, vector<8x30xf32>
    %c0_1 = arith.constant 0 : index
    %c0_2 = arith.constant 0 : index
    %1 = vector.load %arg2[%c0_1, %c0_2] : memref<30x20xf32, #tpu.memory_space<vmem>>, vector<30x20xf32>
    %cst = arith.constant dense<0.000000e+00> : vector<8x20xf32>
    %2 = tpu.matmul %0, %1, %cst {dimension_numbers = #tpu.dot_dimension_numbers<[1], [0], [0], [1], [0, 0, 1, 1], [], []>} : vector<8x30xf32>, vector<30x20xf32>, vector<8x20xf32> -> vector<8x20xf32>
    %c0_3 = arith.constant 0 : index
    %c0_4 = arith.constant 0 : index
    %3 = vector.load %arg3[%c0_3, %c0_4] : memref<1x20xf32, #tpu.memory_space<vmem>>, vector<1x20xf32>
    %4 = vector.broadcast %3 : vector<1x20xf32> to vector<8x20xf32>
    %5 = arith.addf %2, %4 : vector<8x20xf32>
    %cst_5 = arith.constant 0.000000e+00 : f32
    %6 = vector.broadcast %cst_5 : f32 to vector<8x20xf32>
    %7 = arith.maximumf %5, %6 : vector<8x20xf32>
    %c0_6 = arith.constant 0 : index
    %c0_7 = arith.constant 0 : index
    %8 = vector.load %arg4[%c0_6, %c0_7] : memref<20x10xf32, #tpu.memory_space<vmem>>, vector<20x10xf32>
    %cst_8 = arith.constant dense<0.000000e+00> : vector<8x10xf32>
    %9 = tpu.matmul %7, %8, %cst_8 {dimension_numbers = #tpu.dot_dimension_numbers<[1], [0], [0], [1], [0, 0, 1, 1], [], []>} : vector<8x20xf32>, vector<20x10xf32>, vector<8x10xf32> -> vector<8x10xf32>
    %c0_9 = arith.constant 0 : index
    %c0_10 = arith.constant 0 : index
    %10 = vector.load %arg5[%c0_9, %c0_10] : memref<1x10xf32, #tpu.memory_space<vmem>>, vector<1x10xf32>
    %11 = vector.broadcast %10 : vector<1x10xf32> to vector<8x10xf32>
    %12 = arith.addf %9, %11 : vector<8x10xf32>
    %cst_11 = arith.constant 0.000000e+00 : f32
    %13 = vector.broadcast %cst_11 : f32 to vector<8x10xf32>
    %14 = arith.maximumf %12, %13 : vector<8x10xf32>
    %c0_12 = arith.constant 0 : index
    %c0_13 = arith.constant 0 : index
    %15 = vector.load %arg6[%c0_12, %c0_13] : memref<10x2xf32, #tpu.memory_space<vmem>>, vector<10x2xf32>
    %cst_14 = arith.constant dense<0.000000e+00> : vector<8x2xf32>
    %16 = tpu.matmul %14, %15, %cst_14 {dimension_numbers = #tpu.dot_dimension_numbers<[1], [0], [0], [1], [0, 0, 1, 1], [], []>} : vector<8x10xf32>, vector<10x2xf32>, vector<8x2xf32> -> vector<8x2xf32>
    %c0_15 = arith.constant 0 : index
    %c0_16 = arith.constant 0 : index
    %17 = vector.load %arg7[%c0_15, %c0_16] : memref<1x2xf32, #tpu.memory_space<vmem>>, vector<1x2xf32>
    %18 = vector.broadcast %17 : vector<1x2xf32> to vector<8x2xf32>
    %19 = arith.addf %16, %18 : vector<8x2xf32>
    %cst_17 = arith.constant dense<0xFF800000> : vector<8xf32>
    %20 = vector.multi_reduction <maximumf>, %19, %cst_17 [1] : vector<8x2xf32> to vector<8xf32>
    %21 = vector.shape_cast %20 : vector<8xf32> to vector<8x1xf32>
    %22 = vector.broadcast %21 : vector<8x1xf32> to vector<8x2xf32>
    %23 = arith.subf %19, %22 : vector<8x2xf32>
    %24 = math.exp %23 : vector<8x2xf32>
    %cst_18 = arith.constant dense<0.000000e+00> : vector<8xf32>
    %25 = vector.multi_reduction <add>, %24, %cst_18 [1] : vector<8x2xf32> to vector<8xf32>
    %26 = vector.shape_cast %25 : vector<8xf32> to vector<8x1xf32>
    %27 = math.log %26 : vector<8x1xf32>
    %28 = vector.broadcast %27 : vector<8x1xf32> to vector<8x2xf32>
    %29 = arith.subf %23, %28 : vector<8x2xf32>
    %c0_19 = arith.constant 0 : index
    %c0_20 = arith.constant 0 : index
    %30 = vector.load %arg8[%c0_19, %c0_20] : memref<8x2xf32, #tpu.memory_space<vmem>>, vector<8x2xf32>
    tpu.vector_store %arg8[%c0_19, %c0_20], %29 {strides = array<i32>} : memref<8x2xf32, #tpu.memory_space<vmem>>, vector<8x2xf32>,
    return
  }
  func.func @transform_0(%arg0: i32) -> (i32, i32) {
    %c0_i32 = arith.constant 0 : i32
    %c0_i32_0 = arith.constant 0 : i32
    return %arg0, %c0_i32 : i32, i32
  }
  func.func @transform_1(%arg0: i32) -> (i32, i32) {
    %c0_i32 = arith.constant 0 : i32
    %c0_i32_0 = arith.constant 0 : i32
    %c0_i32_1 = arith.constant 0 : i32
    return %c0_i32, %c0_i32_0 : i32, i32
  }
  func.func @transform_2(%arg0: i32) -> (i32, i32) {
    %c0_i32 = arith.constant 0 : i32
    %c0_i32_0 = arith.constant 0 : i32
    %c0_i32_1 = arith.constant 0 : i32
    return %c0_i32, %c0_i32_0 : i32, i32
  }
  func.func @transform_3(%arg0: i32) -> (i32, i32) {
    %c0_i32 = arith.constant 0 : i32
    %c0_i32_0 = arith.constant 0 : i32
    %c0_i32_1 = arith.constant 0 : i32
    return %c0_i32, %c0_i32_0 : i32, i32
  }
  func.func @transform_4(%arg0: i32) -> (i32, i32) {
    %c0_i32 = arith.constant 0 : i32
    %c0_i32_0 = arith.constant 0 : i32
    %c0_i32_1 = arith.constant 0 : i32
    return %c0_i32, %c0_i32_0 : i32, i32
  }
  func.func @transform_5(%arg0: i32) -> (i32, i32) {
    %c0_i32 = arith.constant 0 : i32
    %c0_i32_0 = arith.constant 0 : i32
    %c0_i32_1 = arith.constant 0 : i32
    return %c0_i32, %c0_i32_0 : i32, i32
  }
  func.func @transform_6(%arg0: i32) -> (i32, i32) {
    %c0_i32 = arith.constant 0 : i32
    %c0_i32_0 = arith.constant 0 : i32
    %c0_i32_1 = arith.constant 0 : i32
    return %c0_i32, %c0_i32_0 : i32, i32
  }
  func.func @transform_7(%arg0: i32) -> (i32, i32) {
    %c0_i32 = arith.constant 0 : i32
    %c0_i32_0 = arith.constant 0 : i32
    return %arg0, %c0_i32 : i32, i32
  }
}

</mosaic_0001>

<bundles_post_ra>
// kernel: tpu_custom_call.1
= control target key start
LH: loop header
LB: loop body
LE: loop exit
PB: predicated region body
PF: predicated region fallthrough
CT: control target
= control target key end

     0   :  { %vm39_vm0 = vcmask 1045504   ;;  %vm35_vm1 = vcmask 244736   ;;  %vm75_vm2 = vcmask 1043456   ;;  %vm71_vm3 = vcmask 162816   ;;  %s250_s1 = inlined_call_operand.vmem [shape: f32[30,20], index: 1, kind: input, shape index: {}]   ;;  %s251_s2 = inlined_call_operand.vmem [shape: f32[1,20], index: 2, kind: input, shape index: {}]   ;;  %s252_s0 = inlined_call_operand.vmem [shape: f32[8,30], index: 0, kind: input, shape index: {}]   ;;  %s253_s4 = inlined_call_operand.vmem [shape: f32[1,10], index: 4, kind: input, shape index: {}]   ;;  %s254_s3 = inlined_call_operand.vmem [shape: f32[20,10], index: 3, kind: input, shape index: {}]   ;;  %s255_s6 = inlined_call_operand.vmem [shape: f32[1,2], index: 6, kind: input, shape index: {}]   ;;  %s256_s5 = inlined_call_operand.vmem [shape: f32[10,2], index: 5, kind: input, shape index: {}]   ;;  %s257_s7 = inlined_call_operand.vmem [shape: f32[8,2], index: 7, kind: output, shape index: {}]  }
   0x1   :  { %v30_v0 = vld [vmem:[%s250_s1 + $0x18] sm:$0x3f]  ;;  %v29_v1 = vld [vmem:[%s250_s1 + $0x10] sm:$0xff]  ;;  %v28_v2 = vld [vmem:[%s250_s1 + $0x8] sm:$0xff]  ;;  %vm110_vm4 = vcmask 1041408   ;;  %vm106_vm5 = vcmask 80896  }
   0x2   :  { %152 = vmatpush.msk.msra.mxu0 %vm39_vm0, %v30_v0  ;;  %v27_v3 = vld [vmem:[%s250_s1] sm:$0xff]  ;;  %v66_v5 = vld [vmem:[%s254_s3 + $0x10] sm:$0xf]  ;;  %v65_v6 = vld [vmem:[%s254_s3 + $0x8] sm:$0xff]  ;;  %vm134_vm6 = vcmask 15360  }
   0x3   :  { %v26_v4 = vld [vmem:[%s252_s0] sm:$0xff]  ;;  %154 = vmatpush.msk.msra.mxu1 %vm75_vm2, %v66_v5  ;;  %v101_v12 = vld [vmem:[%s256_s5 + $0x8] sm:$0x3] }
   0x4   :  { %56 = vmatpush.msra.mxu0 %v29_v1  ;;  %v64_v7 = vld [vmem:[%s254_s3] sm:$0xff]  ;;  %156 = vmatpush.msk.msra.mxu2 %vm110_vm4, %v101_v12 }
   0x5   :  { %93 = vmatpush.msra.mxu1 %v65_v6  ;;  %v158_v8 = vld [vmem:[%s251_s2] ss:$0 sm:$0xff] }
   0x6   :  { %57 = vmatpush.msra.mxu0 %v28_v2  ;;  %v100_v13 = vld [vmem:[%s256_s5] sm:$0xff] }
   0x7   :  { %94 = vmatpush.msra.mxu1 %v64_v7  ;;  %129 = vmatpush.msra.mxu2 %v100_v13  ;;  %v159_v14 = vld [vmem:[%s253_s4] ss:$0 sm:$0xff] }
   0x8   :  { %58 = vmatpush.msra.mxu0 %v27_v3  ;;  %v160_v18 = vld [vmem:[%s255_s6] ss:$0 sm:$0xff] }
   0x9   :  { %153 = vmatmul.msk.f32.vlgmr.msra.gmra.mxu0 %vm35_vm1, %v26_v4 }
  0x86   :  { %v60_v9 = vpop.f32.mrf.mxu0 }
  0x87   :  { %v61_v10 = vadd.f32 %v158_v8, %v60_v9 }
  0x89   :  { %v63_v11 = vmax.f32 %v61_v10, 0.0 }
  0x8b   :  { %155 = vmatmul.msk.f32.vlgmr.msra.gmra.mxu1 %vm71_vm3, %v63_v11 }
 0x108   :  { %v96_v15 = vpop.f32.mrf.mxu1 }
 0x109   :  { %v97_v16 = vadd.f32 %v159_v14, %v96_v15 }
 0x10b   :  { %v99_v17 = vmax.f32 %v97_v16, 0.0 }
 0x10d   :  { %157 = vmatmul.msk.f32.vlgmr.msra.gmra.mxu2 %vm106_vm5, %v99_v17 }
 0x190   :  { %v131_v19 = vpop.f32.mrf.mxu2 }
 0x191   :  { %v132_v20 = vadd.f32 %v160_v18, %v131_v19 }
 0x193   :  { %v135_v21 = vsel %vm134_vm6, %v132_v20, -inf }
 0x194   :  { %136 = vmax.xlane.f32.xlu0 %v135_v21 }
 0x207   :  { %v137_v22 = vpop.xlane.xlu0 %136 }
 0x208   :  { %v138_v23 = vsub.f32 %v132_v20, %v137_v22 }
 0x20a   :  { %v139_v24 = vmul.f32 1.442695, %v138_v23 }
 0x20c   :  { %161 = vpow2.f32 %v139_v24 }
 0x212   :  { %v162_v25 = vpop.eup %161 }
 0x213   :  { %v141_v26 = vsel %vm134_vm6, %v162_v25, 0.0 }
 0x214   :  { %142 = vadd.xlane.f32.xlu0 %v141_v26 }
 0x287   :  { %v143_v27 = vpop.xlane.xlu0 %142 }
 0x288   :  { %163 = vlog2.f32 %v143_v27 }
 0x28e   :  { %v164_v28 = vpop.eup %163 }
 0x28f   :  { %v145_v29 = vmul.f32 0.6931472, %v164_v28 }
 0x291   :  { %v146_v30 = vsub.f32 %v138_v23, %v145_v29 }
 0x293   :  { %147 = vst.msk [vmem:[%s257_s7] sm:$0xff] %vm134_vm6, %v146_v30 }

</bundles_post_ra>
